<compile_context>
chip_gen: v7x
topology: tpu7x:2x2x1
jax: 0.10.0
libtpu: 0.0.40
codegen_flags: <defaults>
</compile_context>

<pallas_src>
import functools

import jax
import jax.numpy as jnp
from jax.experimental import pallas as pl
from jax.experimental.pallas import tpu as pltpu


# TODO(synk): `Lambda` wraps an arbitrary Python callable; only elementwise
# callables (exp here) are lowered into the Pallas kernel.  Pure-view callables
# (e.g. x.view(B, -1)) are metadata-only and stay as jnp.reshape glue.
def _lambda_exp_kernel(x_ref, o_ref):
    # Elementwise func(x) = exp(x) on the whole VMEM tile.  exp runs on the EUP
    # (its own VLIW slot); the kernel is HBM-bound so the math is free.
    o_ref[...] = jnp.exp(x_ref[...])


_MAX_LANE = 2048                 # widest lane-dense last dim we consider
_VMEM_LIMIT_CAP = 48 << 20       # stay well inside v7x's 64 MiB physical VMEM
_VMEM_LIMIT_FLOOR = 16 << 20


def _sublane_multiple(dtype):
    # Rows-per-block granularity so blocks map to whole (packed) vregs:
    # f32 -> 8, bf16/f16 -> 16, 8-bit -> 32.
    itemsize = jnp.dtype(dtype).itemsize
    return {4: 8, 2: 16, 1: 32}.get(itemsize, 8)


@functools.lru_cache(maxsize=None)
def _tile_bytes_target():
    # v7x (64 MiB physical VMEM, ~3.2 TB/s HBM): 8 MiB tiles cut the ~0.35 us
    # grid-step overhead to a few percent of the tile transfer time.
    # v5e/v6e (128 MiB VMEM, slower HBM): 4 MiB already hides step overhead and
    # keeps VMEM pressure modest.
    try:
        info = pltpu.get_tpu_info()
        vmem_cap = getattr(info, "vmem_capacity_bytes", None)
    except Exception:  # pragma: no cover - info query is best-effort
        vmem_cap = None
    if vmem_cap is not None and vmem_cap <= (64 << 20):
        return 8 << 20
    return 4 << 20


def lambda_forward(x, *, min_pallas_bytes=128 * 1024, donate_input=False):
    """Lambda(func=exp) forward: exact elementwise exp on an arbitrary-shape x."""
    if not jnp.issubdtype(x.dtype, jnp.floating):
        raise TypeError(f"Lambda(exp) expects a floating dtype, got {x.dtype}")

    orig_shape = x.shape
    dtype = x.dtype
    itemsize = jnp.dtype(dtype).itemsize
    n = x.size
    if n == 0:
        return x

    # Tiny inputs: pallas_call dispatch + pipeline overhead dwarfs the work,
    # and a standalone pallas_call is an XLA fusion barrier anyway.
    if n * itemsize < min_pallas_bytes:
        return jnp.exp(x)

    # Widest lane width (any multiple of 128 up to 2048) that divides n exactly
    # -> unmasked full-width vector stores, no padding, no extra copies.
    lane = next((l for l in range(_MAX_LANE, 0, -128) if n % l == 0), None)
    if lane is None:
        # Ragged element count (not a multiple of 128).  The old pad+slice path
        # cost ~3x the HBM traffic of the exp itself, so fused XLA exp wins.
        # TODO(synk): an in-kernel masked tail (pltpu.store + lane mask) could
        # keep ragged shapes on the Pallas path without extra HBM passes.
        return jnp.exp(x)

    rows = n // lane
    x2d = x.reshape(rows, lane)

    sub = _sublane_multiple(dtype)
    if rows <= sub:
        # Single full-extent block (block dim == array dim is always legal).
        rows_per_block = rows
    else:
        tile_target = _tile_bytes_target()
        target_rows = max(sub, (tile_target // (lane * itemsize)) // sub * sub)
        rows_per_block = min(target_rows, (rows // sub) * sub)
        # Guarantee >= 2 grid steps so dimension_semantics=("parallel",) can
        # shard the stream across both TensorCores on v7x (no-op on v5e/v6e).
        if pl.cdiv(rows, rows_per_block) < 2:
            rows_per_block = max(sub, pl.cdiv(rows, 2 * sub) * sub)

    grid = (pl.cdiv(rows, rows_per_block),)  # ragged trailing row block masked by Pallas

    # Default double-buffering of input + output = 4 resident tiles, plus
    # headroom for Mosaic scratch.  Set the scoped VMEM limit deliberately:
    # always above v5e's 16 MiB default, never above ~48 MiB (v7x physical 64).
    tile_bytes = rows_per_block * lane * itemsize
    vmem_limit = min(max(4 * tile_bytes + (8 << 20), _VMEM_LIMIT_FLOOR),
                     _VMEM_LIMIT_CAP)

    call_kwargs = {}
    if donate_input:
        # Same-shape/dtype elementwise op: alias the input HBM buffer onto the
        # output to halve HBM footprint.  Only enable when the caller's buffer
        # is dead after this op; otherwise XLA inserts a defensive full copy.
        call_kwargs["input_output_aliases"] = {0: 0}

    out2d = pl.pallas_call(
        _lambda_exp_kernel,
        out_shape=jax.ShapeDtypeStruct((rows, lane), dtype),
        grid=grid,
        in_specs=[pl.BlockSpec((rows_per_block, lane), lambda i: (i, 0))],
        out_specs=pl.BlockSpec((rows_per_block, lane), lambda i: (i, 0)),
        compiler_params=pltpu.CompilerParams(
            dimension_semantics=("parallel",),  # shard grid across TCs on v7x
            vmem_limit_bytes=vmem_limit,
        ),
        **call_kwargs,
    )(x2d)

    return out2d.reshape(orig_shape)


if __name__ == "__main__":
    key = jax.random.PRNGKey(0)
    k1, k2, k3 = jax.random.split(key, 3)

    # 1) Small NCHW input consistent with the morphomnist decoder heads.
    #    Force the Pallas path (it is below the production bypass threshold)
    #    so the kernel itself is exercised.
    x_small = jax.random.normal(k1, (2, 4, 16, 16), dtype=jnp.float32)
    y_small = jax.block_until_ready(lambda_forward(x_small, min_pallas_bytes=0))
    assert y_small.shape == x_small.shape and y_small.dtype == x_small.dtype
    assert jnp.allclose(y_small, jnp.exp(x_small), atol=1e-6, rtol=1e-5)

    # 2) Ragged element count (not a multiple of 128): falls back to fused
    #    jnp.exp (the pad+slice Pallas path was strictly slower).
    x_ragged = jax.random.normal(k2, (3, 5, 17, 19), dtype=jnp.float32)
    y_ragged = jax.block_until_ready(lambda_forward(x_ragged, min_pallas_bytes=0))
    assert y_ragged.shape == x_ragged.shape
    assert jnp.allclose(y_ragged, jnp.exp(x_ragged), atol=1e-6, rtol=1e-5)

    # 3) Larger slab (4 MiB f32): default path, lane=2048, tiles clamped so the
    #    grid has >= 2 steps (both v7x TensorCores get work).
    x_big = jax.random.normal(k3, (4, 2, 512, 256), dtype=jnp.float32)
    y_big = jax.block_until_ready(lambda_forward(x_big))
    assert y_big.shape == x_big.shape
    assert jnp.allclose(y_big, jnp.exp(x_big), atol=1e-6, rtol=1e-5)

    print("KERNEL_OK")
</pallas_src>

<mosaic_0001>
module attributes {stable_mosaic.version = 11 : i64} {
  func.func @_lambda_exp_kernel(%arg0: i32, %arg1: memref<1x2048xf32, #tpu.memory_space<vmem>>, %arg2: memref<1x2048xf32, #tpu.memory_space<vmem>>) attributes {dimension_semantics = [#tpu.dimension_semantics<parallel>], iteration_bounds = array<i64: 1>, scalar_prefetch = 0 : i64, scratch_operands = 0 : i64, tpu.core_type = #tpu.core_type<tc>, window_params = [{transform_indices = @transform_0, window_bounds = array<i64: 1, 2048>}, {transform_indices = @transform_1, window_bounds = array<i64: 1, 2048>}]} {
    %c0 = arith.constant 0 : index
    %c0_0 = arith.constant 0 : index
    %0 = vector.load %arg1[%c0, %c0_0] : memref<1x2048xf32, #tpu.memory_space<vmem>>, vector<1x2048xf32>
    %1 = math.exp %0 : vector<1x2048xf32>
    %c0_1 = arith.constant 0 : index
    %c0_2 = arith.constant 0 : index
    %2 = vector.load %arg2[%c0_1, %c0_2] : memref<1x2048xf32, #tpu.memory_space<vmem>>, vector<1x2048xf32>
    tpu.vector_store %arg2[%c0_1, %c0_2], %1 {strides = array<i32>} : memref<1x2048xf32, #tpu.memory_space<vmem>>, vector<1x2048xf32>,
    return
  }
  func.func @transform_0(%arg0: i32) -> (i32, i32) {
    %c0_i32 = arith.constant 0 : i32
    %c0_i32_0 = arith.constant 0 : i32
    return %arg0, %c0_i32 : i32, i32
  }
  func.func @transform_1(%arg0: i32) -> (i32, i32) {
    %c0_i32 = arith.constant 0 : i32
    %c0_i32_0 = arith.constant 0 : i32
    return %arg0, %c0_i32 : i32, i32
  }
}

</mosaic_0001>

<bundles_post_ra>
// kernel: tpu_custom_call.1
= control target key start
LH: loop header
LB: loop body
LE: loop exit
PB: predicated region body
PF: predicated region fallthrough
CT: control target
= control target key end

     0   :  { %6 = vsyncpa [#allocation3], 0  ;;  %s134_s0 = inlined_call_operand.hbm [shape: f32[1,2048], index: 0, kind: input, shape index: {}]   ;;  %s135_s1 = inlined_call_operand.hbm [shape: f32[1,2048], index: 1, kind: output, shape index: {}]  }
   0x1   :  { %7 = vsyncpa [#allocation4], 0  ;;  %s98_s6 = smov [#allocation2]   ;;  %s50_s10 = scalar_lea.hbm %s134_s0, 256 }
   0x2   :  { %s14_s7 = sshll.u32 %s98_s6, 4  ;;  %p51_p0 = scmp.ne.s32.totalorder %s134_s0, %s50_s10  ;;  %s15_s7 = int_to_ptr.vmem [resolvable:$true] %s14_s7 }
   0x3   :  { %p54_p1 = scmp.lt.u32.totalorder %s50_s10, %s134_s0 }
   0x5   :  { %p56_p2 = pnand %p54_p1, %p51_p0 }
   0x7   :  { %59 = shalt.err (!%p56_p2)
}
   0x8   :  { %s60_s15 = scalar_lea.vmem %s15_s7, 256  ;;  %p65_p4 = scmp.lt.s32.totalorder %s15_s7, %s15_s7 }
   0x9   :  { %p61_p3 = scmp.ne.s32.totalorder %s15_s7, %s60_s15  ;;  %p66_p5 = scmp.lt.s32.totalorder %s60_s15, %s60_s15 }
   0xb   :  { %p67_p6 = por %p66_p5, %p65_p4 }
   0xd   :  { %p68_p7 = pnand %p67_p6, %p61_p3 }
   0xf   :  { %71 = shalt.err (!%p68_p7)
}
  0x10   :  { %17 = dma.hbm_to_vmem [thread:$0]  %s134_s0, 256, %s15_s7, [#allocation3]  }
  0x11   :  { %94 = dma.done.wait [#allocation3], 256  }
  0x12   :  { %95 = vsyncadd [#allocation3], 4294967040  ;;  %v21_v0 = vld [vmem:[#allocation2] sm:$0xff]  ;;  %v22_v1 = vld [vmem:[#allocation2 + $0x8] sm:$0xff]  ;;  %s99_s18 = smov [#allocation5]  }
  0x13   :  { %v23_v2 = vmul.f32 1.442695, %v21_v0  ;;  %v25_v3 = vmul.f32 1.442695, %v22_v1  ;;  %s35_s19 = sshll.u32 %s99_s18, 4  ;;  %s36_s19 = int_to_ptr.vmem [resolvable:$true] %s35_s19 }
  0x14   :  { %s72_s20 = scalar_lea.vmem %s36_s19, 256  ;;  %p77_p9 = scmp.lt.s32.totalorder %s36_s19, %s36_s19 }
  0x15   :  { %46 = vpow2.f32 %v23_v2  ;;  %p73_p8 = scmp.ne.s32.totalorder %s36_s19, %s72_s20  ;;  %p78_p10 = scmp.lt.s32.totalorder %s72_s20, %s72_s20 }
  0x16   :  { %48 = vpow2.f32 %v25_v3 }
  0x17   :  { %p79_p11 = por %p78_p10, %p77_p9 }
  0x19   :  { %p80_p12 = pnand %p79_p11, %p73_p8 }
  0x1f   :  { %v47_v4 = vpop.eup %46 }
  0x20   :  { %v49_v5 = vpop.eup %48  ;;  %27 = vst [vmem:[#allocation5] sm:$0xff] %v47_v4 }
  0x21   :  { %28 = vst [vmem:[#allocation5 + $0x8] sm:$0xff] %v49_v5 }
  0x22   :  { %83 = shalt.err (!%p80_p12)
}
  0x23   :  { %s84_s22 = scalar_lea.hbm %s135_s1, 256 }
  0x24   :  { %p85_p13 = scmp.ne.s32.totalorder %s135_s1, %s84_s22  ;;  %p88_p0 = scmp.lt.u32.totalorder %s84_s22, %s135_s1 }
  0x26   :  { %p90_p1 = pnand %p88_p0, %p85_p13 }
  0x28   :  { %93 = shalt.err (!%p90_p1)
}
  0x29   :  { %38 = dma.vmem_to_hbm [thread:$0]  %s36_s19, 256, %s135_s1, [#allocation4]  }
  0x2a   :  { %96 = dma.done.wait [#allocation4], 256  }
  0x2b   :  { %97 = vsyncadd [#allocation4], 4294967040 }
  0x2c   :  { %42 = vsyncpa [#allocation3], 1 }
  0x2d   :  { %43 = vsyncpa [#allocation4], 1 }

</bundles_post_ra>
